<compile_context>
chip_gen: v7x
topology: tpu7x:2x2x1
jax: 0.10.0
libtpu: 0.0.40
codegen_flags: <defaults>
</compile_context>

<pallas_src>
import jax
import jax.numpy as jnp
from jax.experimental import pallas as pl
from jax.experimental.pallas import tpu as pltpu


def _round_up(x, m):
    return (x + m - 1) // m * m


# --------------------------------------------------------------------------
# Kernel: fused 4-layer MLP on one batch tile.
# --------------------------------------------------------------------------
def _mlp_kernel(x_ref,
                w1_ref, b1_ref,
                w2_ref, b2_ref,
                w3_ref, b3_ref,
                w4_ref, b4_ref,
                o_ref):
    """relu(relu(relu(x@W1+b1)@W2+b2)@W3+b3)@W4+b4.

    MXU operands are the weights' dtype (bf16 by default); accumulation, bias
    add and ReLU stay in f32.  x is cast in-kernel so the wrapper never
    rewrites the activation in HBM.
    """
    cdt = w1_ref.dtype

    h = x_ref[...].astype(cdt)
    h = jnp.dot(h, w1_ref[...], preferred_element_type=jnp.float32)
    h = jnp.maximum(h + b1_ref[...], 0.0).astype(cdt)

    h = jnp.dot(h, w2_ref[...], preferred_element_type=jnp.float32)
    h = jnp.maximum(h + b2_ref[...], 0.0).astype(cdt)

    h = jnp.dot(h, w3_ref[...], preferred_element_type=jnp.float32)
    h = jnp.maximum(h + b3_ref[...], 0.0).astype(cdt)

    out = jnp.dot(h, w4_ref[...], preferred_element_type=jnp.float32) + b4_ref[...]
    o_ref[...] = out.astype(o_ref.dtype)


# --------------------------------------------------------------------------
# One-time parameter prep (hoisted out of the per-call path).
# --------------------------------------------------------------------------
def prepare_mlp_params(params, compute_dtype=jnp.bfloat16):
    """Casts weights to the MXU compute dtype and biases to f32 once.

    Call this once (e.g. right after init / checkpoint load) and reuse the
    result across forward calls, so no per-call weight traffic occurs.
    """
    prepped = {}
    for i in range(1, 5):
        w = jnp.asarray(params[f"w{i}"])
        b = jnp.asarray(params[f"b{i}"]).reshape(1, -1)
        prepped[f"w{i}"] = w.astype(compute_dtype)
        prepped[f"b{i}"] = b.astype(jnp.float32)
    return prepped


def _pick_batch_tile(n):
    """MXU-filling, bf16-sublane-aligned (x16) batch tile.

    >=128 rows whenever n >= 128 (MXU is 128/256 rows wide); 256-512 rows for
    large n; >=2 grid steps once n >= 256 so both v7x TensorCores have work.
    """
    if n <= 32:
        tile = _round_up(max(n, 16), 16)
    elif n < 128:
        tile = _round_up((n + 1) // 2, 16)      # two steps for dual-TC v7x
    elif n < 512:
        tile = 128
    else:
        tile = min(512, max(128, (n // 2) // 128 * 128))
    return min(tile, _round_up(n, 16))


def _vmem_cap_bytes():
    """Usable per-TensorCore VMEM (generation-aware: 64 MiB on v7x)."""
    try:
        cap = int(pltpu.get_tpu_info().vmem_capacity_bytes)
    except Exception:          # narrow fallback: info query only, never the kernel
        cap = 64 << 20         # conservative (v7x per-TC)
    return (cap * 7) // 8      # leave ~12.5% for compiler-internal scratch


# --------------------------------------------------------------------------
# Forward wrapper.
# --------------------------------------------------------------------------
def mlp_forward(x, prepped, *, batch_tile=None, out_dtype=None, interpret=False):
    """Runs the fused MLP Pallas kernel.

    x:        [N, in_dim] activations (any float dtype; cast in-kernel).
    prepped:  output of prepare_mlp_params (w1..w4 [fan_in, fan_out], b1..b4 [1, fan_out]).
    returns:  (out, None, None, None) -- mirroring the PyTorch forward.
    """
    n, in_dim = x.shape
    hid_dim = prepped["w1"].shape[1]
    out_dim = prepped["w4"].shape[1]
    out_dtype = x.dtype if out_dtype is None else out_dtype

    # ---- batch tile / grid -------------------------------------------------
    if batch_tile is None:
        batch_tile = _pick_batch_tile(n)
    batch_tile = max(16, _round_up(int(batch_tile), 16))
    grid_steps = pl.cdiv(n, batch_tile)

    # ---- VMEM budget (generation-aware cap; guard resident-weight design) --
    def _isize(dt):
        return jnp.dtype(dt).itemsize

    weight_bytes = sum(int(a.size) * _isize(a.dtype) for a in prepped.values())
    x_tile_bytes = batch_tile * in_dim * _isize(x.dtype)
    o_tile_bytes = batch_tile * out_dim * _isize(out_dtype)
    inter_bytes = 4 * batch_tile * max(in_dim, hid_dim, out_dim) * 4  # f32 temps / spill

    vmem_cap = _vmem_cap_bytes()
    need = (2 * weight_bytes                       # default double-buffered weights
            + 2 * (x_tile_bytes + o_tile_bytes)    # pipelined I/O tiles
            + inter_bytes
            + (8 << 20))                           # headroom
    if need > vmem_cap:
        # TODO(synk): stream W2/W3 blocks over a hidden-dim grid axis instead of
        # keeping all weights VMEM-resident (needed for very large hid_dim on v7x).
        raise ValueError(
            f"MLP weights + tiles need ~{need >> 20} MiB VMEM but only "
            f"{vmem_cap >> 20} MiB is available; reduce hid_dim/batch_tile or add "
            f"a weight-streaming path.")
    vmem_limit = int(min(max(need, 32 << 20), vmem_cap))

    # ---- scheduler cost hint ------------------------------------------------
    flops = 2 * n * (in_dim * hid_dim + 2 * hid_dim * hid_dim + hid_dim * out_dim)
    bytes_accessed = (n * in_dim * _isize(x.dtype)
                      + weight_bytes
                      + n * out_dim * _isize(out_dtype))
    cost = pl.CostEstimate(flops=int(flops), transcendentals=0,
                           bytes_accessed=int(bytes_accessed))

    # ---- BlockSpecs ----------------------------------------------------------
    # x / out are tiled along the batch only; feature blocks span the full array
    # dims (always legal, no padding required).  Weights/biases use a constant
    # index_map, so Pallas DMAs them a single time for the whole grid.
    def row_map(i):
        return (i, 0)

    def full_map(i):
        return (0, 0)

    in_specs = [
        pl.BlockSpec((batch_tile, in_dim), row_map),    # x tile (pipelined)
        pl.BlockSpec((in_dim, hid_dim), full_map),      # w1
        pl.BlockSpec((1, hid_dim), full_map),           # b1
        pl.BlockSpec((hid_dim, hid_dim), full_map),     # w2
        pl.BlockSpec((1, hid_dim), full_map),           # b2
        pl.BlockSpec((hid_dim, hid_dim), full_map),     # w3
        pl.BlockSpec((1, hid_dim), full_map),           # b3
        pl.BlockSpec((hid_dim, out_dim), full_map),     # w4
        pl.BlockSpec((1, out_dim), full_map),           # b4
    ]

    out = pl.pallas_call(
        _mlp_kernel,
        out_shape=jax.ShapeDtypeStruct((n, out_dim), out_dtype),
        grid=(grid_steps,),
        in_specs=in_specs,
        out_specs=pl.BlockSpec((batch_tile, out_dim), row_map),
        compiler_params=pltpu.CompilerParams(
            dimension_semantics=("parallel",),
            vmem_limit_bytes=vmem_limit),
        cost_estimate=cost,
        interpret=interpret,
    )(x,
      prepped["w1"], prepped["b1"],
      prepped["w2"], prepped["b2"],
      prepped["w3"], prepped["b3"],
      prepped["w4"], prepped["b4"])

    return out, None, None, None


# --------------------------------------------------------------------------
# Init + reference (for the self-test).
# --------------------------------------------------------------------------
def init_mlp_params(key, in_dim, hid_dim, out_dim, dtype=jnp.float32):
    """Init mimicking PyTorch nn.Linear defaults (U(-1/sqrt(fan_in), +1/sqrt(fan_in))).
    Weights stored as [fan_in, fan_out] (pre-transposed vs torch's [out, in])."""
    dims = [(in_dim, hid_dim), (hid_dim, hid_dim), (hid_dim, hid_dim),
            (hid_dim, out_dim)]
    params = {}
    for idx, (fan_in, fan_out) in enumerate(dims, start=1):
        key, kw, kb = jax.random.split(key, 3)
        bound = 1.0 / (fan_in ** 0.5)
        params[f"w{idx}"] = jax.random.uniform(
            kw, (fan_in, fan_out), dtype, minval=-bound, maxval=bound)
        params[f"b{idx}"] = jax.random.uniform(
            kb, (1, fan_out), dtype, minval=-bound, maxval=bound)
    return params


def _reference_mlp(x, params, compute_dtype=jnp.float32):
    """Pure-JAX reference matching the kernel's mixed-precision recipe."""
    def lin(h, w, b):
        return jnp.dot(h.astype(compute_dtype), w.astype(compute_dtype),
                       preferred_element_type=jnp.float32) + b.astype(jnp.float32)
    h = jnp.maximum(lin(x, params["w1"], params["b1"]), 0.0)
    h = jnp.maximum(lin(h, params["w2"], params["b2"]), 0.0)
    h = jnp.maximum(lin(h, params["w3"], params["b3"]), 0.0)
    return lin(h, params["w4"], params["b4"])


if __name__ == "__main__":
    # Small shapes consistent with the module: data['fts'] is [N, in_dim].
    # NOTE: at shapes this tiny a Pallas kernel is pure overhead vs plain jnp;
    # the tiling policy is aimed at realistic (larger) N / hid_dim.
    N, IN_DIM, HID_DIM, OUT_DIM = 16, 4, 32, 4

    key = jax.random.PRNGKey(0)
    key, kx = jax.random.split(key)
    x = jax.random.normal(kx, (N, IN_DIM), jnp.float32)
    params = init_mlp_params(key, IN_DIM, HID_DIM, OUT_DIM)

    # One-time weight prep (bf16 weights, f32 biases) -- reused across calls.
    prepped = prepare_mlp_params(params, compute_dtype=jnp.bfloat16)

    data = {"fts": x}
    out, _, _, _ = mlp_forward(data["fts"], prepped)
    out = jax.block_until_ready(out)

    ref = _reference_mlp(x, params, compute_dtype=jnp.bfloat16)
    assert out.shape == (N, OUT_DIM)
    assert jnp.allclose(out, ref.astype(out.dtype), atol=5e-3, rtol=5e-3), \
        "mismatch vs reference"

    print("KERNEL_OK")
</pallas_src>

<mosaic_0001>
module attributes {stable_mosaic.version = 11 : i64} {
  func.func @_mlp_kernel(%arg0: i32, %arg1: memref<16x4xf32, #tpu.memory_space<vmem>>, %arg2: memref<4x32xbf16, #tpu.memory_space<vmem>>, %arg3: memref<1x32xf32, #tpu.memory_space<vmem>>, %arg4: memref<32x32xbf16, #tpu.memory_space<vmem>>, %arg5: memref<1x32xf32, #tpu.memory_space<vmem>>, %arg6: memref<32x32xbf16, #tpu.memory_space<vmem>>, %arg7: memref<1x32xf32, #tpu.memory_space<vmem>>, %arg8: memref<32x4xbf16, #tpu.memory_space<vmem>>, %arg9: memref<1x4xf32, #tpu.memory_space<vmem>>, %arg10: memref<16x4xf32, #tpu.memory_space<vmem>>) attributes {dimension_semantics = [#tpu.dimension_semantics<parallel>], iteration_bounds = array<i64: 1>, scalar_prefetch = 0 : i64, scratch_operands = 0 : i64, tpu.core_type = #tpu.core_type<tc>, window_params = [{transform_indices = @transform_0, window_bounds = array<i64: 16, 4>}, {pipeline_mode = #tpu.pipeline_mode<synchronous>, transform_indices = @transform_1, window_bounds = array<i64: 4, 32>}, {pipeline_mode = #tpu.pipeline_mode<synchronous>, transform_indices = @transform_2, window_bounds = array<i64: 1, 32>}, {pipeline_mode = #tpu.pipeline_mode<synchronous>, transform_indices = @transform_3, window_bounds = array<i64: 32, 32>}, {pipeline_mode = #tpu.pipeline_mode<synchronous>, transform_indices = @transform_4, window_bounds = array<i64: 1, 32>}, {pipeline_mode = #tpu.pipeline_mode<synchronous>, transform_indices = @transform_5, window_bounds = array<i64: 32, 32>}, {pipeline_mode = #tpu.pipeline_mode<synchronous>, transform_indices = @transform_6, window_bounds = array<i64: 1, 32>}, {pipeline_mode = #tpu.pipeline_mode<synchronous>, transform_indices = @transform_7, window_bounds = array<i64: 32, 4>}, {pipeline_mode = #tpu.pipeline_mode<synchronous>, transform_indices = @transform_8, window_bounds = array<i64: 1, 4>}, {transform_indices = @transform_9, window_bounds = array<i64: 16, 4>}]} {
    %c0 = arith.constant 0 : index
    %c0_0 = arith.constant 0 : index
    %0 = vector.load %arg1[%c0, %c0_0] : memref<16x4xf32, #tpu.memory_space<vmem>>, vector<16x4xf32>
    %1 = arith.truncf %0 : vector<16x4xf32> to vector<16x4xbf16>
    %c0_1 = arith.constant 0 : index
    %c0_2 = arith.constant 0 : index
    %2 = vector.load %arg2[%c0_1, %c0_2] : memref<4x32xbf16, #tpu.memory_space<vmem>>, vector<4x32xbf16>
    %cst = arith.constant dense<0.000000e+00> : vector<16x32xf32>
    %3 = tpu.matmul %1, %2, %cst {dimension_numbers = #tpu.dot_dimension_numbers<[1], [0], [0], [1], [0, 0, 1, 1], [], []>} : vector<16x4xbf16>, vector<4x32xbf16>, vector<16x32xf32> -> vector<16x32xf32>
    %c0_3 = arith.constant 0 : index
    %c0_4 = arith.constant 0 : index
    %4 = vector.load %arg3[%c0_3, %c0_4] : memref<1x32xf32, #tpu.memory_space<vmem>>, vector<1x32xf32>
    %5 = vector.broadcast %4 : vector<1x32xf32> to vector<16x32xf32>
    %6 = arith.addf %3, %5 : vector<16x32xf32>
    %cst_5 = arith.constant 0.000000e+00 : f32
    %7 = vector.broadcast %cst_5 : f32 to vector<16x32xf32>
    %8 = arith.maximumf %6, %7 : vector<16x32xf32>
    %9 = arith.truncf %8 : vector<16x32xf32> to vector<16x32xbf16>
    %c0_6 = arith.constant 0 : index
    %c0_7 = arith.constant 0 : index
    %10 = vector.load %arg4[%c0_6, %c0_7] : memref<32x32xbf16, #tpu.memory_space<vmem>>, vector<32x32xbf16>
    %cst_8 = arith.constant dense<0.000000e+00> : vector<16x32xf32>
    %11 = tpu.matmul %9, %10, %cst_8 {dimension_numbers = #tpu.dot_dimension_numbers<[1], [0], [0], [1], [0, 0, 1, 1], [], []>} : vector<16x32xbf16>, vector<32x32xbf16>, vector<16x32xf32> -> vector<16x32xf32>
    %c0_9 = arith.constant 0 : index
    %c0_10 = arith.constant 0 : index
    %12 = vector.load %arg5[%c0_9, %c0_10] : memref<1x32xf32, #tpu.memory_space<vmem>>, vector<1x32xf32>
    %13 = vector.broadcast %12 : vector<1x32xf32> to vector<16x32xf32>
    %14 = arith.addf %11, %13 : vector<16x32xf32>
    %cst_11 = arith.constant 0.000000e+00 : f32
    %15 = vector.broadcast %cst_11 : f32 to vector<16x32xf32>
    %16 = arith.maximumf %14, %15 : vector<16x32xf32>
    %17 = arith.truncf %16 : vector<16x32xf32> to vector<16x32xbf16>
    %c0_12 = arith.constant 0 : index
    %c0_13 = arith.constant 0 : index
    %18 = vector.load %arg6[%c0_12, %c0_13] : memref<32x32xbf16, #tpu.memory_space<vmem>>, vector<32x32xbf16>
    %cst_14 = arith.constant dense<0.000000e+00> : vector<16x32xf32>
    %19 = tpu.matmul %17, %18, %cst_14 {dimension_numbers = #tpu.dot_dimension_numbers<[1], [0], [0], [1], [0, 0, 1, 1], [], []>} : vector<16x32xbf16>, vector<32x32xbf16>, vector<16x32xf32> -> vector<16x32xf32>
    %c0_15 = arith.constant 0 : index
    %c0_16 = arith.constant 0 : index
    %20 = vector.load %arg7[%c0_15, %c0_16] : memref<1x32xf32, #tpu.memory_space<vmem>>, vector<1x32xf32>
    %21 = vector.broadcast %20 : vector<1x32xf32> to vector<16x32xf32>
    %22 = arith.addf %19, %21 : vector<16x32xf32>
    %cst_17 = arith.constant 0.000000e+00 : f32
    %23 = vector.broadcast %cst_17 : f32 to vector<16x32xf32>
    %24 = arith.maximumf %22, %23 : vector<16x32xf32>
    %25 = arith.truncf %24 : vector<16x32xf32> to vector<16x32xbf16>
    %c0_18 = arith.constant 0 : index
    %c0_19 = arith.constant 0 : index
    %26 = vector.load %arg8[%c0_18, %c0_19] : memref<32x4xbf16, #tpu.memory_space<vmem>>, vector<32x4xbf16>
    %cst_20 = arith.constant dense<0.000000e+00> : vector<16x4xf32>
    %27 = tpu.matmul %25, %26, %cst_20 {dimension_numbers = #tpu.dot_dimension_numbers<[1], [0], [0], [1], [0, 0, 1, 1], [], []>} : vector<16x32xbf16>, vector<32x4xbf16>, vector<16x4xf32> -> vector<16x4xf32>
    %c0_21 = arith.constant 0 : index
    %c0_22 = arith.constant 0 : index
    %28 = vector.load %arg9[%c0_21, %c0_22] : memref<1x4xf32, #tpu.memory_space<vmem>>, vector<1x4xf32>
    %29 = vector.broadcast %28 : vector<1x4xf32> to vector<16x4xf32>
    %30 = arith.addf %27, %29 : vector<16x4xf32>
    %c0_23 = arith.constant 0 : index
    %c0_24 = arith.constant 0 : index
    %31 = vector.load %arg10[%c0_23, %c0_24] : memref<16x4xf32, #tpu.memory_space<vmem>>, vector<16x4xf32>
    tpu.vector_store %arg10[%c0_23, %c0_24], %30 {strides = array<i32>} : memref<16x4xf32, #tpu.memory_space<vmem>>, vector<16x4xf32>,
    return
  }
  func.func @transform_0(%arg0: i32) -> (i32, i32) {
    %c0_i32 = arith.constant 0 : i32
    %c0_i32_0 = arith.constant 0 : i32
    return %arg0, %c0_i32 : i32, i32
  }
  func.func @transform_1(%arg0: i32) -> (i32, i32) {
    %c0_i32 = arith.constant 0 : i32
    %c0_i32_0 = arith.constant 0 : i32
    %c0_i32_1 = arith.constant 0 : i32
    return %c0_i32, %c0_i32_0 : i32, i32
  }
  func.func @transform_2(%arg0: i32) -> (i32, i32) {
    %c0_i32 = arith.constant 0 : i32
    %c0_i32_0 = arith.constant 0 : i32
    %c0_i32_1 = arith.constant 0 : i32
    return %c0_i32, %c0_i32_0 : i32, i32
  }
  func.func @transform_3(%arg0: i32) -> (i32, i32) {
    %c0_i32 = arith.constant 0 : i32
    %c0_i32_0 = arith.constant 0 : i32
    %c0_i32_1 = arith.constant 0 : i32
    return %c0_i32, %c0_i32_0 : i32, i32
  }
  func.func @transform_4(%arg0: i32) -> (i32, i32) {
    %c0_i32 = arith.constant 0 : i32
    %c0_i32_0 = arith.constant 0 : i32
    %c0_i32_1 = arith.constant 0 : i32
    return %c0_i32, %c0_i32_0 : i32, i32
  }
  func.func @transform_5(%arg0: i32) -> (i32, i32) {
    %c0_i32 = arith.constant 0 : i32
    %c0_i32_0 = arith.constant 0 : i32
    %c0_i32_1 = arith.constant 0 : i32
    return %c0_i32, %c0_i32_0 : i32, i32
  }
  func.func @transform_6(%arg0: i32) -> (i32, i32) {
    %c0_i32 = arith.constant 0 : i32
    %c0_i32_0 = arith.constant 0 : i32
    %c0_i32_1 = arith.constant 0 : i32
    return %c0_i32, %c0_i32_0 : i32, i32
  }
  func.func @transform_7(%arg0: i32) -> (i32, i32) {
    %c0_i32 = arith.constant 0 : i32
    %c0_i32_0 = arith.constant 0 : i32
    %c0_i32_1 = arith.constant 0 : i32
    return %c0_i32, %c0_i32_0 : i32, i32
  }
  func.func @transform_8(%arg0: i32) -> (i32, i32) {
    %c0_i32 = arith.constant 0 : i32
    %c0_i32_0 = arith.constant 0 : i32
    %c0_i32_1 = arith.constant 0 : i32
    return %c0_i32, %c0_i32_0 : i32, i32
  }
  func.func @transform_9(%arg0: i32) -> (i32, i32) {
    %c0_i32 = arith.constant 0 : i32
    %c0_i32_0 = arith.constant 0 : i32
    return %arg0, %c0_i32 : i32, i32
  }
}

</mosaic_0001>

<bundles_post_ra>
// kernel: tpu_custom_call.1
= control target key start
LH: loop header
LB: loop body
LE: loop exit
PB: predicated region body
PF: predicated region fallthrough
CT: control target
= control target key end

     0   :  { %vm48_vm0 = vcmask 1041408   ;;  %v373_v0 = vmov 0.0   ;;  %vm374_vm1 = vmmov 0   ;;  %vm44_vm2 = vcmask 31744   ;;  %s480_s1 = inlined_call_operand.vmem [shape: bf16[4,32], index: 1, kind: input, shape index: {}]   ;;  %s481_s0 = inlined_call_operand.vmem [shape: f32[16,4], index: 0, kind: input, shape index: {}]   ;;  %s482_s3 = inlined_call_operand.vmem [shape: bf16[32,32], index: 3, kind: input, shape index: {}]   ;;  %s483_s2 = inlined_call_operand.vmem [shape: f32[1,32], index: 2, kind: input, shape index: {}]   ;;  %s484_s5 = inlined_call_operand.vmem [shape: bf16[32,32], index: 5, kind: input, shape index: {}]   ;;  %s485_s4 = inlined_call_operand.vmem [shape: f32[1,32], index: 4, kind: input, shape index: {}]   ;;  %s486_s7 = inlined_call_operand.vmem [shape: bf16[32,4], index: 7, kind: input, shape index: {}]   ;;  %s487_s6 = inlined_call_operand.vmem [shape: f32[1,32], index: 6, kind: input, shape index: {}]   ;;  %s488_s8 = inlined_call_operand.vmem [shape: f32[1,4], index: 8, kind: input, shape index: {}]   ;;  %s489_s9 = inlined_call_operand.vmem [shape: f32[16,4], index: 9, kind: output, shape index: {}]  }
   0x1   :  { %335 = vmatprep.subr.bf16.mxu0 %v373_v0  ;;  %v36_v1 = vld [vmem:[%s480_s1] sm:$0x3]  ;;  %337 = vmatprep.mubr.msk.bf16.mxu0 %vm374_vm1, %v373_v0  ;;  %v34_v3 = vld [vmem:[%s481_s0 + $0x8] sm:$0xff]  ;;  %vm119_vm3 = vcmask 261120  }
   0x2   :  { %v33_v2 = vld [vmem:[%s481_s0] sm:$0xff]  ;;  %v50_v4 = vsel %vm48_vm0, %v36_v1, 0  ;;  %341 = vmatprep.subr.bf16.mxu1 %v373_v0  ;;  %345 = vmatprep.mubr.msk.bf16.mxu1 %vm374_vm1, %v373_v0  ;;  %v368_v7 = vld [vmem:[%s482_s3 + $0x8] sm:$0xff]  }
   0x3   :  { %v35_v5 = vpack.c.bf16 %v34_v3, %v33_v2  ;;  %336 = vmatpush3.bf16.msra.mxu0 %v50_v4  ;;  %v367_v6 = vld [vmem:[%s482_s3] sm:$0xff]   ;;  %v370_v19 = vld [vmem:[%s484_s5 + $0x8] sm:$0xff]  }
   0x4   :  { %349 = vmatprep.subr.bf16.mxu0 %v373_v0  ;;  %342 = vmatpush3.bf16.msra.mxu1 %v367_v6  ;;  %v310_v8 = vld [vmem:[%s483_s2] ss:$0 sm:$0xff]  ;;  %v372_v31 = vld [vmem:[%s486_s7 + $0x8] sm:$0xff]  }
   0x5   :  { %343 = vmatprep.subr.bf16.mxu1 %v373_v0  ;;  %v369_v18 = vld [vmem:[%s484_s5] sm:$0xff]  }
   0x6   :  { %338 = vmatmul.mubr.msk.bf16.vlgmr.msra.gmra.mrb[0].mxu0 %vm44_vm2, %v35_v5  ;;  %v312_v20 = vld [vmem:[%s485_s4] ss:$0 sm:$0xff] }
   0x7   :  { %353 = vmatprep.mubr.msk.bf16.mxu0 %vm374_vm1, %v373_v0  ;;  %350 = vmatpush3.bf16.msra.mxu0 %v369_v18  ;;  %v371_v30 = vld [vmem:[%s486_s7] sm:$0xff]  }
   0x8   :  { %344 = vmatpush3.bf16.msra.mxu1 %v368_v7  ;;  %351 = vmatprep.subr.bf16.mxu0 %v373_v0  ;;  %v316_v32 = vld [vmem:[%s487_s6] ss:$0 sm:$0xff] }
   0x9   :  { %357 = vmatprep.subr.bf16.mxu1 %v373_v0  ;;  %v320_v42 = vld [vmem:[%s488_s8] ss:$0 sm:$0xff] }
   0xb   :  { %352 = vmatpush3.bf16.msra.mxu0 %v370_v19 }
  0xd9   :  { %v86_v9 = vpop.f32.mrb[0].mxu0 }
  0xda   :  { %v87_v10 = vadd.f32 %v310_v8, %v86_v9  ;;  %v339_v11 = vpop.f32.mrb[1].mxu0 }
  0xdb   :  { %v89_v12 = vpop.f32.mrb[2].mxu0 }
  0xdc   :  { %v90_v13 = vadd.f32 %v310_v8, %v89_v12  ;;  %v340_v14 = vpop.f32.mrb[3].mxu0  ;;  %v93_v15 = vmax.f32 %v87_v10, 0.0 }
  0xde   :  { %v94_v16 = vmax.f32 %v90_v13, 0.0 }
  0xe0   :  { %v95_v17 = vpack.c.bf16 %v94_v16, %v93_v15 }
  0xe2   :  { %346 = vmatmul.mubr.msk.bf16.vlgmr.msra.gmra.mrb[0].mxu1 %vm119_vm3, %v95_v17 }
  0xe3   :  { %361 = vmatprep.mubr.msk.bf16.mxu1 %vm374_vm1, %v373_v0  ;;  %358 = vmatpush3.bf16.msra.mxu1 %v371_v30 }
  0xe4   :  { %359 = vmatprep.subr.bf16.mxu1 %v373_v0 }
  0xe7   :  { %360 = vmatpush3.bf16.msra.mxu1 %v372_v31 }
 0x1b5   :  { %v157_v21 = vpop.f32.mrb[0].mxu1 }
 0x1b6   :  { %v158_v22 = vadd.f32 %v312_v20, %v157_v21  ;;  %v347_v23 = vpop.f32.mrb[1].mxu1 }
 0x1b7   :  { %v160_v24 = vpop.f32.mrb[2].mxu1 }
 0x1b8   :  { %v161_v25 = vadd.f32 %v312_v20, %v160_v24  ;;  %v348_v26 = vpop.f32.mrb[3].mxu1  ;;  %v164_v27 = vmax.f32 %v158_v22, 0.0 }
 0x1ba   :  { %v165_v28 = vmax.f32 %v161_v25, 0.0 }
 0x1bc   :  { %v166_v29 = vpack.c.bf16 %v165_v28, %v164_v27 }
 0x1be   :  { %354 = vmatmul.mubr.msk.bf16.vlgmr.msra.gmra.mrb[4].mxu0 %vm119_vm3, %v166_v29 }
 0x291   :  { %v227_v33 = vpop.f32.mrb[4].mxu0 }
 0x292   :  { %v228_v34 = vadd.f32 %v316_v32, %v227_v33  ;;  %v355_v35 = vpop.f32.mrb[5].mxu0 }
 0x293   :  { %v230_v36 = vpop.f32.mrb[6].mxu0 }
 0x294   :  { %v231_v37 = vadd.f32 %v316_v32, %v230_v36  ;;  %v356_v38 = vpop.f32.mrb[7].mxu0  ;;  %v234_v39 = vmax.f32 %v228_v34, 0.0 }
 0x296   :  { %v235_v40 = vmax.f32 %v231_v37, 0.0 }
 0x298   :  { %v236_v41 = vpack.c.bf16 %v235_v40, %v234_v39 }
 0x29a   :  { %362 = vmatmul.mubr.msk.bf16.vlgmr.msra.gmra.mrb[4].mxu1 %vm119_vm3, %v236_v41 }
 0x36d   :  { %v297_v43 = vpop.f32.mrb[4].mxu1 }
 0x36e   :  { %v298_v44 = vadd.f32 %v320_v42, %v297_v43  ;;  %v363_v45 = vpop.f32.mrb[5].mxu1 }
 0x36f   :  { %v300_v46 = vpop.f32.mrb[6].mxu1 }
 0x370   :  { %304 = vst.msk [vmem:[%s489_s9] sm:$0xff] %vm44_vm2, %v298_v44  ;;  %v301_v47 = vadd.f32 %v320_v42, %v300_v46  ;;  %v364_v48 = vpop.f32.mrb[7].mxu1 }
 0x372   :  { %305 = vst.msk [vmem:[%s489_s9 + $0x8] sm:$0xff] %vm44_vm2, %v301_v47 }

</bundles_post_ra>
